<compile_context>
chip_gen: v7x
topology: tpu7x:2x2x1
jax: 0.10.0
libtpu: 0.0.40
codegen_flags: <defaults>
</compile_context>

<pallas_src>
import numpy as np
import jax
import jax.numpy as jnp
from jax import lax
from jax.experimental import pallas as pl
from jax.experimental.pallas import tpu as pltpu

N_FEATS = 4
KSIZE = 3
PAD = KSIZE // 2
RES_SCALE = 1.0  # matches default res_scale=1


def _resblock_kernel(xp_ref, w1_ref, b1_ref, w2_ref, b2_ref, o_ref):
    # xp_ref: (1, H+2p, W*C)   H-padded input, rows flattened to W*C lanes
    # w*_ref: (K*W*C, W*C)     banded conv weights (dy blocks stacked on rows)
    # b*_ref: (1, W*C)         bias, tiled across the W positions
    # o_ref:  (1, H, W*C)      output
    _, H, WC = o_ref.shape
    K = KSIZE

    xp = xp_ref[0]                                   # (H+2p, W*C)

    # ---- conv1: single MXU matmul over the 3-row window ----
    x3 = jnp.concatenate([xp[dy:dy + H, :] for dy in range(K)], axis=1)  # (H, K*W*C)
    h = jnp.dot(x3, w1_ref[...], preferred_element_type=jnp.float32)
    h = jnp.maximum(h + b1_ref[...], 0.0)            # bias + ReLU, (H, W*C)

    # ---- re-pad the intermediate along H only (two zero rows, no scratch) ----
    zrow = jnp.zeros((PAD, WC), jnp.float32)
    hp = jnp.concatenate([zrow, h, zrow], axis=0)    # (H+2p, W*C)

    # ---- conv2: single MXU matmul ----
    h3 = jnp.concatenate([hp[dy:dy + H, :] for dy in range(K)], axis=1)  # (H, K*W*C)
    res = jnp.dot(h3, w2_ref[...], preferred_element_type=jnp.float32) + b2_ref[...]

    # ---- scale + residual add (residual = interior rows of padded input) ----
    res = res * RES_SCALE + xp[PAD:PAD + H, :]
    o_ref[...] = res[None].astype(o_ref.dtype)


def _band_weights(w_hwio, W):
    """(K, K, C, C) HWIO conv weights -> banded matmul weights (K*W*C, W*C).

    For each kernel row dy, block [dy] maps a flattened padded row
    (xin*C + ci) to output positions (x*C + co) with weight w[dy, dx, ci, co]
    where xin = x + dx - 1; taps falling outside [0, W) are dropped, which is
    exactly the zero "SAME" padding along W.
    """
    K = w_hwio.shape[0]
    w = w_hwio.astype(jnp.float32)
    blocks = []
    for dy in range(K):
        blk = sum(
            jnp.kron(jnp.eye(W, k=1 - dx, dtype=jnp.float32), w[dy, dx])
            for dx in range(K)
        )
        blocks.append(blk)                            # (W*C, W*C)
    return jnp.concatenate(blocks, axis=0)            # (K*W*C, W*C)


def resblock_pallas(x_nchw, w1_hwio, b1, w2_hwio, b2):
    """x_nchw: (B, C, H, W) float32. Returns (B, C, H, W)."""
    B, C, H, W = x_nchw.shape
    K = KSIZE
    WC = W * C

    # Glue (plain JAX): layout transform + H-only padding + weight banding.
    x_nhwc = jnp.transpose(x_nchw, (0, 2, 3, 1)).astype(jnp.float32)
    x_rows = x_nhwc.reshape(B, H, WC)
    x_pad = jnp.pad(x_rows, ((0, 0), (PAD, PAD), (0, 0)))      # (B, H+2p, W*C)

    w1b = _band_weights(w1_hwio, W)                            # (K*W*C, W*C)
    w2b = _band_weights(w2_hwio, W)
    b1r = jnp.tile(b1.astype(jnp.float32), W).reshape(1, WC)   # (1, W*C)
    b2r = jnp.tile(b2.astype(jnp.float32), W).reshape(1, WC)

    Hp = H + 2 * PAD

    out_rows = pl.pallas_call(
        _resblock_kernel,
        out_shape=jax.ShapeDtypeStruct((B, H, WC), jnp.float32),
        grid_spec=pltpu.PrefetchScalarGridSpec(
            num_scalar_prefetch=0,
            grid=(B,),
            in_specs=[
                pl.BlockSpec((1, Hp, WC), lambda b: (b, 0, 0)),   # padded input
                pl.BlockSpec((K * WC, WC), lambda b: (0, 0)),     # banded w1
                pl.BlockSpec((1, WC), lambda b: (0, 0)),          # bias 1
                pl.BlockSpec((K * WC, WC), lambda b: (0, 0)),     # banded w2
                pl.BlockSpec((1, WC), lambda b: (0, 0)),          # bias 2
            ],
            out_specs=pl.BlockSpec((1, H, WC), lambda b: (b, 0, 0)),
        ),
        # NOTE: at real EDSR sizes (n_feats>=64, large H/W), tile the grid over
        # H-strips with a 1-row halo and raise vmem_limit_bytes here; at this
        # toy size whole-image blocks fit the default scoped VMEM easily.
        compiler_params=pltpu.CompilerParams(
            dimension_semantics=("parallel",)),
    )(x_pad, w1b, b1r, w2b, b2r)

    out_nhwc = out_rows.reshape(B, H, W, C)
    return jnp.transpose(out_nhwc, (0, 3, 1, 2))


def resblock_reference(x_nchw, w1_hwio, b1, w2_hwio, b2):
    """Pure-JAX reference using lax.conv (independent of kernel math)."""
    x_nhwc = jnp.transpose(x_nchw, (0, 2, 3, 1)).astype(jnp.float32)
    dn = ("NHWC", "HWIO", "NHWC")
    h = lax.conv_general_dilated(x_nhwc, w1_hwio, (1, 1), "SAME",
                                 dimension_numbers=dn) + b1
    h = jnp.maximum(h, 0.0)
    h = lax.conv_general_dilated(h, w2_hwio, (1, 1), "SAME",
                                 dimension_numbers=dn) + b2
    out = h * RES_SCALE + x_nhwc
    return jnp.transpose(out, (0, 3, 1, 2))


if __name__ == "__main__":
    key = jax.random.PRNGKey(0)
    kx, k1, kb1, k2, kb2 = jax.random.split(key, 5)

    B, C, H, W = 2, N_FEATS, 16, 16
    x = jax.random.normal(kx, (B, C, H, W), dtype=jnp.float32)

    # Deterministic synthetic parameters (Conv2d(n_feats, n_feats, 3, bias=True) x2),
    # stored directly in HWIO = (K, K, C_in, C_out).
    w1 = jax.random.normal(k1, (KSIZE, KSIZE, C, C), dtype=jnp.float32) * 0.1
    b1 = jax.random.normal(kb1, (C,), dtype=jnp.float32) * 0.1
    w2 = jax.random.normal(k2, (KSIZE, KSIZE, C, C), dtype=jnp.float32) * 0.1
    b2 = jax.random.normal(kb2, (C,), dtype=jnp.float32) * 0.1

    out = resblock_pallas(x, w1, b1, w2, b2)
    out = jax.block_until_ready(out)

    ref = jax.block_until_ready(resblock_reference(x, w1, b1, w2, b2))
    assert out.shape == (B, C, H, W)
    np.testing.assert_allclose(np.asarray(out), np.asarray(ref),
                               rtol=1e-4, atol=1e-4)

    print("KERNEL_OK")
</pallas_src>

<mosaic_0001>
module attributes {stable_mosaic.version = 11 : i64} {
  func.func @_resblock_kernel(%arg0: i32, %arg1: memref<1x18x64xf32, #tpu.memory_space<vmem>>, %arg2: memref<192x64xf32, #tpu.memory_space<vmem>>, %arg3: memref<1x64xf32, #tpu.memory_space<vmem>>, %arg4: memref<192x64xf32, #tpu.memory_space<vmem>>, %arg5: memref<1x64xf32, #tpu.memory_space<vmem>>, %arg6: memref<1x16x64xf32, #tpu.memory_space<vmem>>) attributes {dimension_semantics = [#tpu.dimension_semantics<parallel>], iteration_bounds = array<i64: 2>, scalar_prefetch = 0 : i64, scratch_operands = 0 : i64, tpu.core_type = #tpu.core_type<tc>, window_params = [{transform_indices = @transform_0, window_bounds = array<i64: 1, 18, 64>}, {pipeline_mode = #tpu.pipeline_mode<synchronous>, transform_indices = @transform_1, window_bounds = array<i64: 192, 64>}, {pipeline_mode = #tpu.pipeline_mode<synchronous>, transform_indices = @transform_2, window_bounds = array<i64: 1, 64>}, {pipeline_mode = #tpu.pipeline_mode<synchronous>, transform_indices = @transform_3, window_bounds = array<i64: 192, 64>}, {pipeline_mode = #tpu.pipeline_mode<synchronous>, transform_indices = @transform_4, window_bounds = array<i64: 1, 64>}, {transform_indices = @transform_5, window_bounds = array<i64: 1, 16, 64>}]} {
    %c0 = arith.constant 0 : index
    %c0_0 = arith.constant 0 : index
    %c0_1 = arith.constant 0 : index
    %0 = vector.load %arg1[%c0, %c0_0, %c0_1] : memref<1x18x64xf32, #tpu.memory_space<vmem>>, vector<1x18x64xf32>
    %1 = vector.shape_cast %0 : vector<1x18x64xf32> to vector<18x64xf32>
    %2 = vector.extract_strided_slice %1 {offsets = [0, 0], sizes = [16, 64], strides = [1, 1]} : vector<18x64xf32> to vector<16x64xf32>
    %3 = vector.extract_strided_slice %1 {offsets = [1, 0], sizes = [16, 64], strides = [1, 1]} : vector<18x64xf32> to vector<16x64xf32>
    %4 = vector.extract_strided_slice %1 {offsets = [2, 0], sizes = [16, 64], strides = [1, 1]} : vector<18x64xf32> to vector<16x64xf32>
    %5 = tpu.concatenate %2, %3, %4 in 1 : vector<16x64xf32>, vector<16x64xf32>, vector<16x64xf32> -> vector<16x192xf32>
    %c0_2 = arith.constant 0 : index
    %c0_3 = arith.constant 0 : index
    %6 = vector.load %arg2[%c0_2, %c0_3] : memref<192x64xf32, #tpu.memory_space<vmem>>, vector<192x64xf32>
    %cst = arith.constant dense<0.000000e+00> : vector<16x64xf32>
    %7 = tpu.matmul %5, %6, %cst {dimension_numbers = #tpu.dot_dimension_numbers<[1], [0], [0], [1], [0, 0, 1, 1], [], []>} : vector<16x192xf32>, vector<192x64xf32>, vector<16x64xf32> -> vector<16x64xf32>
    %c0_4 = arith.constant 0 : index
    %c0_5 = arith.constant 0 : index
    %8 = vector.load %arg3[%c0_4, %c0_5] : memref<1x64xf32, #tpu.memory_space<vmem>>, vector<1x64xf32>
    %9 = vector.broadcast %8 : vector<1x64xf32> to vector<16x64xf32>
    %10 = arith.addf %7, %9 : vector<16x64xf32>
    %cst_6 = arith.constant 0.000000e+00 : f32
    %11 = vector.broadcast %cst_6 : f32 to vector<16x64xf32>
    %12 = arith.maximumf %10, %11 : vector<16x64xf32>
    %cst_7 = arith.constant 0.000000e+00 : f32
    %13 = vector.broadcast %cst_7 : f32 to vector<1x64xf32>
    %14 = tpu.concatenate %13, %12, %13 in 0 : vector<1x64xf32>, vector<16x64xf32>, vector<1x64xf32> -> vector<18x64xf32>
    %15 = vector.extract_strided_slice %14 {offsets = [0, 0], sizes = [16, 64], strides = [1, 1]} : vector<18x64xf32> to vector<16x64xf32>
    %16 = vector.extract_strided_slice %14 {offsets = [1, 0], sizes = [16, 64], strides = [1, 1]} : vector<18x64xf32> to vector<16x64xf32>
    %17 = vector.extract_strided_slice %14 {offsets = [2, 0], sizes = [16, 64], strides = [1, 1]} : vector<18x64xf32> to vector<16x64xf32>
    %18 = tpu.concatenate %15, %16, %17 in 1 : vector<16x64xf32>, vector<16x64xf32>, vector<16x64xf32> -> vector<16x192xf32>
    %c0_8 = arith.constant 0 : index
    %c0_9 = arith.constant 0 : index
    %19 = vector.load %arg4[%c0_8, %c0_9] : memref<192x64xf32, #tpu.memory_space<vmem>>, vector<192x64xf32>
    %cst_10 = arith.constant dense<0.000000e+00> : vector<16x64xf32>
    %20 = tpu.matmul %18, %19, %cst_10 {dimension_numbers = #tpu.dot_dimension_numbers<[1], [0], [0], [1], [0, 0, 1, 1], [], []>} : vector<16x192xf32>, vector<192x64xf32>, vector<16x64xf32> -> vector<16x64xf32>
    %c0_11 = arith.constant 0 : index
    %c0_12 = arith.constant 0 : index
    %21 = vector.load %arg5[%c0_11, %c0_12] : memref<1x64xf32, #tpu.memory_space<vmem>>, vector<1x64xf32>
    %22 = vector.broadcast %21 : vector<1x64xf32> to vector<16x64xf32>
    %23 = arith.addf %20, %22 : vector<16x64xf32>
    %cst_13 = arith.constant 1.000000e+00 : f32
    %24 = vector.broadcast %cst_13 : f32 to vector<16x64xf32>
    %25 = arith.mulf %23, %24 : vector<16x64xf32>
    %26 = vector.extract_strided_slice %1 {offsets = [1, 0], sizes = [16, 64], strides = [1, 1]} : vector<18x64xf32> to vector<16x64xf32>
    %27 = arith.addf %25, %26 : vector<16x64xf32>
    %28 = vector.shape_cast %27 : vector<16x64xf32> to vector<1x16x64xf32>
    %c0_14 = arith.constant 0 : index
    %c0_15 = arith.constant 0 : index
    %c0_16 = arith.constant 0 : index
    %29 = vector.load %arg6[%c0_14, %c0_15, %c0_16] : memref<1x16x64xf32, #tpu.memory_space<vmem>>, vector<1x16x64xf32>
    tpu.vector_store %arg6[%c0_14, %c0_15, %c0_16], %28 {strides = array<i32>} : memref<1x16x64xf32, #tpu.memory_space<vmem>>, vector<1x16x64xf32>,
    return
  }
  func.func @transform_0(%arg0: i32) -> (i32, i32, i32) {
    %c0_i32 = arith.constant 0 : i32
    %c0_i32_0 = arith.constant 0 : i32
    %c0_i32_1 = arith.constant 0 : i32
    return %arg0, %c0_i32, %c0_i32_0 : i32, i32, i32
  }
  func.func @transform_1(%arg0: i32) -> (i32, i32) {
    %c0_i32 = arith.constant 0 : i32
    %c0_i32_0 = arith.constant 0 : i32
    %c0_i32_1 = arith.constant 0 : i32
    return %c0_i32, %c0_i32_0 : i32, i32
  }
  func.func @transform_2(%arg0: i32) -> (i32, i32) {
    %c0_i32 = arith.constant 0 : i32
    %c0_i32_0 = arith.constant 0 : i32
    %c0_i32_1 = arith.constant 0 : i32
    return %c0_i32, %c0_i32_0 : i32, i32
  }
  func.func @transform_3(%arg0: i32) -> (i32, i32) {
    %c0_i32 = arith.constant 0 : i32
    %c0_i32_0 = arith.constant 0 : i32
    %c0_i32_1 = arith.constant 0 : i32
    return %c0_i32, %c0_i32_0 : i32, i32
  }
  func.func @transform_4(%arg0: i32) -> (i32, i32) {
    %c0_i32 = arith.constant 0 : i32
    %c0_i32_0 = arith.constant 0 : i32
    %c0_i32_1 = arith.constant 0 : i32
    return %c0_i32, %c0_i32_0 : i32, i32
  }
  func.func @transform_5(%arg0: i32) -> (i32, i32, i32) {
    %c0_i32 = arith.constant 0 : i32
    %c0_i32_0 = arith.constant 0 : i32
    %c0_i32_1 = arith.constant 0 : i32
    return %arg0, %c0_i32, %c0_i32_0 : i32, i32, i32
  }
}

</mosaic_0001>

<bundles_post_ra>
// kernel: tpu_custom_call.1
= control target key start
LH: loop header
LB: loop body
LE: loop exit
PB: predicated region body
PF: predicated region fallthrough
CT: control target
= control target key end

     0   :  { %10 = vsyncpa [#allocation3], 0  ;;  %s1135_s0 = inlined_call_operand.vmem [shape: f32[2,18,64], index: 0, kind: input, shape index: {}]   ;;  %s1136_s1 = inlined_call_operand.vmem [shape: f32[192,64], index: 1, kind: input, shape index: {}]   ;;  %s1137_s2 = inlined_call_operand.vmem [shape: f32[1,64], index: 2, kind: input, shape index: {}]   ;;  %s1138_s3 = inlined_call_operand.vmem [shape: f32[192,64], index: 3, kind: input, shape index: {}]   ;;  %s1139_s4 = inlined_call_operand.vmem [shape: f32[1,64], index: 4, kind: input, shape index: {}]   ;;  %s1140_s5 = inlined_call_operand.hbm [shape: f32[2,16,64], index: 5, kind: output, shape index: {}]  }
   0x1   :  { %12 = vsyncpa [#allocation3 + $0x1], 0  ;;  %s818_s18 = smov 0   ;;  %s820_s19 = smov 0  }
   0x2   :  { %s822_s20 = smov 0   ;;  %s824_s21 = smov 0  }
   0x3 LB: > { %s839_s22 = sadd.s32 4294967295, %s781_s21   ;;  %s585_s23 = sadd.s32 4294967294, %s781_s21   ;;  %s781_s21 = sphi %s824_s21, %s1146_s21   ;;  %s777_s20 = sphi %s822_s20, %s1145_s20   ;;  %s773_s19 = sphi %s820_s19, %s1144_s19   ;;  %s769_s18 = sphi %s818_s18, %s1143_s18  }
   0x4   : > { %s843_s24 = sadd.s32 1, %s781_s21   ;;  %s135_s25 = sadd.s32 1, %s777_s20 }
   0x5   : > { %s132_s26 = ssub.s32 %s781_s21, %s843_s24  ;;  %p145_p0 = scmp.ne.s32.totalorder %s777_s20, %s773_s19 }
   0x6   : > { %p133_p1 = scmp.eq.s32.totalorder %s132_s26, 0  ;;  %p146_p2 = scmp.eq.s32.totalorder %s839_s22, 1 }
   0x7   : > { %p151_p3 = scmp.ne.s32.totalorder %s773_s19, %s769_s18  ;;  %p152_p4 = scmp.eq.s32.totalorder %s585_s23, 1 }
   0x8   : > { %s854_s27 = scalar_select %p133_p1, %s777_s20, %s135_s25  }
   0x9   : > { %p856_p5 = por %p146_p2, %p145_p0  ;;  %p860_p6 = por %p152_p4, %p151_p3 }
   0xa   : > { %p588_p7 = scmp.ge.s32.totalorder %s781_s21, 1  ;;  %p190_p8 = scmp.lt.s32.totalorder %s781_s21, 3 }
   0xc   : > { %p191_p9 = pnand %p588_p7, %p190_p8 }
   0xd   : > { %p218_p10 = scmp.lt.s32.totalorder (!%p191_p9), %s839_s22, 1  ;;  %v250_v0 = vld [vmem:[%s1136_s1] sm:$0xff] (!%p191_p9)  ;;  %v251_v1 = vld [vmem:[%s1136_s1 + $0x8] sm:$0xff] (!%p191_p9)  ;;  %v783_v2 = vmov (!%p191_p9), 0.0|0.0   ;;  %v252_v4 = vld [vmem:[%s1136_s1 + $0x10] sm:$0xff] (!%p191_p9)  ;;  %vm229_vm0 = vcmask (!%p191_p9), 1046528  }
   0xe   : > { %194 = sbr.rel (%p191_p9) target bundleno = 723 (0x2d3), region = 40  ;;  %603 = vmatprep.subr.bf16.mxu0 (!%p191_p9), %v783_v2  ;;  %v604_v3 = vpack.c.bf16 (!%p191_p9), %v251_v1, %v250_v0  ;;  %v253_v5 = vld [vmem:[%s1136_s1 + $0x18] sm:$0xff] (!%p191_p9)  ;;  %639 = vmatprep.subr.bf16.mxu1 (!%p191_p9), %v783_v2  ;;  %v254_v7 = vld [vmem:[%s1136_s1 + $0x20] sm:$0xff] (!%p191_p9)  ;;  %v255_v8 = vld [vmem:[%s1136_s1 + $0x28] sm:$0xff] (!%p191_p9)  ;;  %vm241_vm1 = vcmask (!%p191_p9), 1045504   ;;  %vm247_vm2 = vcmask (!%p191_p9), 523264  }
   0xf   : > { %v607_v6 = vpack.c.bf16 (!%p191_p9), %v253_v5, %v252_v4  ;;  %v610_v12 = vpack.c.bf16 (!%p191_p9), %v255_v8, %v254_v7  ;;  %v256_v16 = vld [vmem:[%s1136_s1 + $0x30] sm:$0xff] (!%p191_p9)  ;;  %v257_v17 = vld [vmem:[%s1136_s1 + $0x38] sm:$0xff] (!%p191_p9)  ;;  %s784_s10 = smov (!%p191_p9), 64   ;;  %v258_v26 = vld [vmem:[%s1136_s1 + $0x40] sm:$0xff] (!%p191_p9)  ;;  %vm364_vm3 = vcmask (!%p191_p9), 1040384   ;;  %s215_s23 = sand.u32 (!%p191_p9), 1, %s773_s19  }
  0x10   : > { %605 = vmatpush1.bf16.msra.mxu0 (!%p191_p9), %v604_v3  ;;  %v613_v22 = vpack.c.bf16 (!%p191_p9), %v257_v17, %v256_v16  ;;  %v259_v27 = vld [vmem:[%s1136_s1 + $0x48] sm:$0xff] (!%p191_p9)  ;;  %v260_v29 = vld [vmem:[%s1136_s1 + $0x50] sm:$0xff] (!%p191_p9)  ;;  %v261_v30 = vld [vmem:[%s1136_s1 + $0x58] sm:$0xff] (!%p191_p9)  ;;  %s602_s7 = sshll.u32 (!%p191_p9), %s839_s22, 8 }
  0x11   : > { %606 = vmatprep.subr.bf16.mxu0 (!%p191_p9), %v783_v2  ;;  %v616_v28 = vpack.c.bf16 (!%p191_p9), %v259_v27, %v258_v26  ;;  %v619_v31 = vpack.c.bf16 (!%p191_p9), %v261_v30, %v260_v29  ;;  %v262_v32 = vld [vmem:[%s1136_s1 + $0x60] sm:$0xff] (!%p191_p9)  ;;  %v263_v33 = vld [vmem:[%s1136_s1 + $0x68] sm:$0xff] (!%p191_p9)  ;;  %v264_v35 = vld [vmem:[%s1136_s1 + $0x70] sm:$0xff] (!%p191_p9)  ;;  %s1088_s11 = scalar_lea.hbm (!%p191_p9), %s1140_s5, %s602_s7 }
  0x12   : > { %v622_v34 = vpack.c.bf16 (!%p191_p9), %v263_v33, %v262_v32  ;;  %v265_v36 = vld [vmem:[%s1136_s1 + $0x78] sm:$0xff] (!%p191_p9)  ;;  %v266_v38 = vld [vmem:[%s1136_s1 + $0x80] sm:$0xff] (!%p191_p9)  ;;  %v267_v39 = vld [vmem:[%s1136_s1 + $0x88] sm:$0xff] (!%p191_p9) }
  0x13   : > { %v625_v37 = vpack.c.bf16 (!%p191_p9), %v265_v36, %v264_v35  ;;  %v628_v40 = vpack.c.bf16 (!%p191_p9), %v267_v39, %v266_v38  ;;  %v268_v41 = vld [vmem:[%s1136_s1 + $0x90] sm:$0xff] (!%p191_p9)  ;;  %v269_v42 = vld [vmem:[%s1136_s1 + $0x98] sm:$0xff] (!%p191_p9)  ;;  %v270_v44 = vld [vmem:[%s1136_s1 + $0xa0] sm:$0xff] (!%p191_p9) }
  0x14   : > { %608 = vmatpush1.bf16.msra.mxu0 (!%p191_p9), %v607_v6  ;;  %v631_v43 = vpack.c.bf16 (!%p191_p9), %v269_v42, %v268_v41  ;;  %v271_v45 = vld [vmem:[%s1136_s1 + $0xa8] sm:$0xff] (!%p191_p9)  ;;  %v272_v47 = vld [vmem:[%s1136_s1 + $0xb0] sm:$0xff] (!%p191_p9)  ;;  %v273_v48 = vld [vmem:[%s1136_s1 + $0xb8] sm:$0xff] (!%p191_p9) }
  0x15   : > { %s219_s13 = scalar_select %p218_p10, %s839_s22, 1  ;;  %609 = vmatprep.subr.bf16.mxu0 %v783_v2  ;;  %v634_v46 = vpack.c.bf16 %v271_v45, %v270_v44  ;;  %v637_v49 = vpack.c.bf16 %v273_v48, %v272_v47  ;;  %v393_v54 = vld [vmem:[%s1138_s3] sm:$0xff]  ;;  %v394_v55 = vld [vmem:[%s1138_s3 + $0x8] sm:$0xff]  ;;  %v395_v56 = vld [vmem:[%s1138_s3 + $0x10] sm:$0xff] }
  0x16   : > { %v640_v57 = vpack.c.bf16 %v394_v55, %v393_v54  ;;  %v396_v58 = vld [vmem:[%s1138_s3 + $0x18] sm:$0xff]  ;;  %v397_v60 = vld [vmem:[%s1138_s3 + $0x20] sm:$0xff]  ;;  %v398_v61 = vld [vmem:[%s1138_s3 + $0x28] sm:$0xff]  ;;  %s1094_s22 = scalar_lea.sflag [#allocation3], %s215_s23 }
  0x17   : > { %s675_s14 = smul.u32 24, %s219_s13  ;;  %v643_v59 = vpack.c.bf16 %v396_v58, %v395_v56  ;;  %v646_v62 = vpack.c.bf16 %v398_v61, %v397_v60  ;;  %v399_v63 = vld [vmem:[%s1138_s3 + $0x30] sm:$0xff]  ;;  %v400_v0 = vld [vmem:[%s1138_s3 + $0x38] sm:$0xff]  ;;  %v401_v3 = vld [vmem:[%s1138_s3 + $0x40] sm:$0xff]  ;;  %s785_s13 = smov [#allocation2]  }
  0x18   : > { %611 = vmatpush1.bf16.msra.mxu0 %v610_v12  ;;  %641 = vmatpush1.bf16.msra.mxu1 %v640_v57  ;;  %v649_v1 = vpack.c.bf16 %v400_v0, %v399_v63  ;;  %v402_v4 = vld [vmem:[%s1138_s3 + $0x48] sm:$0xff]  ;;  %v403_v6 = vld [vmem:[%s1138_s3 + $0x50] sm:$0xff]  ;;  %v404_v7 = vld [vmem:[%s1138_s3 + $0x58] sm:$0xff] }
  0x19   : > { %s222_s30 = scalar_lea.vmem %s1135_s0, %s675_s14  ;;  %612 = vmatprep.subr.bf16.mxu0 %v783_v2  ;;  %642 = vmatprep.subr.bf16.mxu1 %v783_v2  ;;  %v652_v5 = vpack.c.bf16 %v402_v4, %v401_v3  ;;  %v655_v8 = vpack.c.bf16 %v404_v7, %v403_v6  ;;  %v407_v12 = vld [vmem:[%s1138_s3 + $0x70] sm:$0xff]  ;;  %v410_v16 = vld [vmem:[%s1138_s3 + $0x88] sm:$0xff]  ;;  %v416_v27 = vld [vmem:[%s1138_s3 + $0xb8] sm:$0xff]  ;;  %s723_s14 = sshll.u32 %s785_s13, 4  ;;  %s724_s14 = int_to_ptr.vmem [resolvable:$false] %s723_s14 }
  0x1a   : > { %v892_v9 = vld [vmem:[%s222_s30] sm:$0xff]  ;;  %v894_v10 = vld [vmem:[%s222_s30 + $0x8] sm:$0xff]  ;;  %v225_v11 = vld [vmem:[%s222_s30 + $0x10] sm:$0x3]  ;;  %s589_s30 = sshll.u32 %s215_s23, 4  ;;  %s725_s15 = scalar_lea.vmem %s724_s14, 512 }
  0x1b   : > { %v230_v13 = vrot.slane %v892_v9, 1  ;;  %v231_v14 = vrot.slane %v894_v10, 1  ;;  %v233_v15 = vrot.slane %v225_v11, 1  ;;  %v242_v18 = vrot.slane %v892_v9, 2  ;;  %v415_v26 = vld [vmem:[%s1138_s3 + $0xb0] sm:$0xff] }
  0x1c   : > { %v243_v19 = vrot.slane %v894_v10, 2  ;;  %v245_v20 = vrot.slane %v225_v11, 2  ;;  %614 = vmatpush1.bf16.msra.mxu0 %v613_v22  ;;  %644 = vmatpush1.bf16.msra.mxu1 %v643_v59  ;;  %v413_v22 = vld [vmem:[%s1138_s3 + $0xa0] sm:$0xff] }
  0x1d   : > { %v908_v21 = vsel %vm229_vm0, %v230_v13, %v231_v14  ;;  %v915_v25 = vsel %vm229_vm0, %v231_v14, %v233_v15  ;;  %615 = vmatprep.subr.bf16.mxu0 %v783_v2  ;;  %645 = vmatprep.subr.bf16.mxu1 %v783_v2  ;;  %v408_v13 = vld [vmem:[%s1138_s3 + $0x78] sm:$0xff]  ;;  %v409_v15 = vld [vmem:[%s1138_s3 + $0x80] sm:$0xff] }
  0x1e   : > { %235 = vrot.lane.b32.xlu0 %v908_v21, %s784_s10  ;;  %v244_v23 = vsel %vm241_vm1, %v242_v18, %v243_v19  ;;  %v246_v24 = vsel %vm241_vm1, %v243_v19, %v245_v20  ;;  %v661_v14 = vpack.c.bf16 %v408_v13, %v407_v12  ;;  %v664_v17 = vpack.c.bf16 %v410_v16, %v409_v15  ;;  %v411_v18 = vld [vmem:[%s1138_s3 + $0x90] sm:$0xff]  ;;  %v412_v19 = vld [vmem:[%s1138_s3 + $0x98] sm:$0xff]  ;;  %v591_v29 = vld [vmem:[%s1137_s2] ss:$0 sm:$0xff] }
  0x1f   : > { %592 = vmatprep.mubr.msk.f32.mxu0 %vm247_vm2, %v244_v23  ;;  %v667_v20 = vpack.c.bf16 %v412_v19, %v411_v18  ;;  %v414_v23 = vld [vmem:[%s1138_s3 + $0xa8] sm:$0xff]  ;;  %v594_v56 = vld [vmem:[%s1139_s4] ss:$0 sm:$0xff] }
  0x20   : > { %617 = vmatpush1.bf16.msra.mxu0 %v616_v28  ;;  %647 = vmatpush1.bf16.msra.mxu1 %v646_v62  ;;  %v673_v28 = vpack.c.bf16 %v416_v27, %v415_v26 }
  0x21   : > { %618 = vmatprep.subr.bf16.mxu0 %v783_v2  ;;  %648 = vmatprep.subr.bf16.mxu1 %v783_v2 }
  0x22   : > { %237 = vrot.lane.b32.xlu0 %v915_v25, %s784_s10 }
  0x24   : > { %620 = vmatpush1.bf16.msra.mxu0 %v619_v31  ;;  %650 = vmatpush1.bf16.msra.mxu1 %v649_v1 }
  0x25   : > { %621 = vmatprep.subr.bf16.mxu0 %v783_v2  ;;  %651 = vmatprep.subr.bf16.mxu1 %v783_v2 }
  0x28   : > { %623 = vmatpush1.bf16.msra.mxu0 %v622_v34  ;;  %653 = vmatpush1.bf16.msra.mxu1 %v652_v5 }
  0x29   : > { %624 = vmatprep.subr.bf16.mxu0 %v783_v2  ;;  %654 = vmatprep.subr.bf16.mxu1 %v783_v2 }
  0x2c   : > { %626 = vmatpush1.bf16.msra.mxu0 %v625_v37  ;;  %656 = vmatpush1.bf16.msra.mxu1 %v655_v8 }
  0x2d   : > { %627 = vmatprep.subr.bf16.mxu0 %v783_v2  ;;  %657 = vmatprep.subr.bf16.mxu1 %v783_v2 }
  0x30   : > { %629 = vmatpush1.bf16.msra.mxu0 %v628_v40 }
  0x31   : > { %630 = vmatprep.subr.bf16.mxu0 %v783_v2 }
  0x34   : > { %632 = vmatpush1.bf16.msra.mxu0 %v631_v43 }
  0x35   : > { %633 = vmatprep.subr.bf16.mxu0 %v783_v2 }
  0x38   : > { %635 = vmatpush1.bf16.msra.mxu0 %v634_v46 }
  0x39   : > { %636 = vmatprep.subr.bf16.mxu0 %v783_v2 }
  0x3c   : > { %638 = vmatpush1.bf16.msra.mxu0 %v637_v49 }
  0x90   : > { %v236_v50 = vpop.permute.xlu0 %235 }
  0x91   : > { %v248_v51 = vsel %vm247_vm2, %v892_v9, %v236_v50  ;;  %v405_v9 = vld [vmem:[%s1138_s3 + $0x60] sm:$0xff] }
  0x92   : > { %350 = vmatmul.mubr.f32.vlgmr.msra.gmra.mrb[0].mxu0 %v248_v51 }
  0x93   : > { %593 = vmatprep.mubr.msk.f32.mxu0 %vm247_vm2, %v246_v24  ;;  %v670_v24 = vpack.c.bf16 %v414_v23, %v413_v22 }
  0x94   : > { %v238_v52 = vpop.permute.xlu0 %237 }
  0x95   : > { %v249_v53 = vsel %vm247_vm2, %v894_v10, %v238_v52  ;;  %v406_v10 = vld [vmem:[%s1138_s3 + $0x68] sm:$0xff] }
  0x96   : > { %355 = vmatmul.mubr.f32.gmra.mrb[2].mxu0 %v249_v53  ;;  %v658_v11 = vpack.c.bf16 %v406_v10, %v405_v9 }
  0x98   : > { %659 = vmatpush1.bf16.msra.mxu1 %v658_v11 }
  0x99   : > { %660 = vmatprep.subr.bf16.mxu1 %v783_v2 }
  0x9c   : > { %662 = vmatpush1.bf16.msra.mxu1 %v661_v14 }
  0x9d   : > { %663 = vmatprep.subr.bf16.mxu1 %v783_v2 }
  0xa0   : > { %665 = vmatpush1.bf16.msra.mxu1 %v664_v17 }
  0xa1   : > { %666 = vmatprep.subr.bf16.mxu1 %v783_v2 }
  0xa4   : > { %668 = vmatpush1.bf16.msra.mxu1 %v667_v20 }
  0xa5   : > { %669 = vmatprep.subr.bf16.mxu1 %v783_v2 }
  0xa8   : > { %671 = vmatpush1.bf16.msra.mxu1 %v670_v24 }
  0xa9   : > { %672 = vmatprep.subr.bf16.mxu1 %v783_v2 }
  0xac   : > { %674 = vmatpush1.bf16.msra.mxu1 %v673_v28 }
 0x165   : > { %v351_v30 = vpop.f32.mrb[0].mxu0 }
 0x166   : > { %v352_v31 = vadd.f32 %v591_v29, %v351_v30  ;;  %v353_v32 = vpop.f32.mrb[1].mxu0 }
 0x168   : > { %v360_v33 = vmax.f32 %v352_v31, 0.0 }
 0x169   : > { %v356_v34 = vpop.f32.mrb[2].mxu0 }
 0x16a   : > { %v365_v35 = vrot.slane %v360_v33, 7  ;;  %v357_v36 = vadd.f32 %v591_v29, %v356_v34  ;;  %v358_v37 = vpop.f32.mrb[3].mxu0 }
 0x16c   : > { %v361_v38 = vmax.f32 %v357_v36, 0.0  ;;  %v371_v39 = vsel %vm364_vm3, 0.0, %v365_v35 }
 0x16d   : > { %v386_v2 = vrot.slane %v371_v39, 2  ;;  %v375_v45 = vrot.slane %v371_v39, 1 }
 0x16e   : > { %v366_v40 = vrot.slane %v361_v38, 7 }
 0x170   : > { %v367_v41 = vsel %vm364_vm3, %v365_v35, %v366_v40  ;;  %v372_v42 = vsel %vm364_vm3, %v366_v40, 0.0 }
 0x171   : > { %v389_v43 = vrot.slane %v372_v42, 2  ;;  %v387_v44 = vrot.slane %v367_v41, 2  ;;  %v376_v46 = vrot.slane %v367_v41, 1  ;;  %v378_v47 = vrot.slane %v372_v42, 1 }
 0x173   : > { %v388_v48 = vsel %vm241_vm1, %v386_v2, %v387_v44  ;;  %v377_v49 = vsel %vm229_vm0, %v375_v45, %v376_v46  ;;  %v390_v50 = vsel %vm241_vm1, %v387_v44, %v389_v43  ;;  %v379_v51 = vsel %vm229_vm0, %v376_v46, %v378_v47 }
 0x174   : > { %595 = vmatprep.mubr.msk.f32.mxu1 %vm247_vm2, %v388_v48  ;;  %380 = vrot.lane.b32.xlu1 %v377_v49, %s784_s10 }
 0x178   : > { %382 = vrot.lane.b32.xlu1 %v379_v51, %s784_s10  ;;  %s217_s10 = scalar_lea.vmem [#allocation2], %s589_s30 }
 0x179   : > { %s523_s6 = sshll.u32 %s217_s10, 4  ;;  %s1090_s6 = int_to_ptr.vmem [resolvable:$true] %s523_s6 }
 0x17a   : > { %s719_s12 = scalar_lea.vmem %s1090_s6, 256  ;;  %p726_p0 = scmp.lt.s32.totalorder %s1090_s6, %s724_s14 }
 0x17b   : > { %p720_p11 = scmp.ne.s32.totalorder %s1090_s6, %s719_s12  ;;  %p727_p1 = scmp.lt.s32.totalorder %s725_s15, %s719_s12 }
 0x17d   : > { %p721_p12 = pnand %p720_p11, %p856_p5  ;;  %p728_p2 = por %p727_p1, %p726_p0 }
 0x17f   : > { %p722_p13 = pneg %p721_p12 }
 0x181   : > { %p729_p3 = pnand %p728_p2, %p722_p13 }
 0x1e6   : > { %v381_v52 = vpop.permute.xlu1 %380 }
 0x1e7   : > { %v391_v53 = vsel %vm247_vm2, %v371_v39, %v381_v52 }
 0x1e8   : > { %493 = vmatmul.mubr.f32.vlgmr.msra.gmra.mrb[0].mxu1 %v391_v53 }
 0x1e9   : > { %596 = vmatprep.mubr.msk.f32.mxu1 %vm247_vm2, %v390_v50 }
 0x1ea   : > { %v383_v54 = vpop.permute.xlu1 %382 }
 0x1eb   : > { %v392_v55 = vsel %vm247_vm2, %v367_v41, %v383_v54 }
 0x1ec   : > { %498 = vmatmul.mubr.f32.gmra.mrb[2].mxu1 %v392_v55 }
 0x2bb   : > { %v494_v57 = vpop.f32.mrb[0].mxu1 }
 0x2bc   : > { %v495_v58 = vadd.f32 %v594_v56, %v494_v57  ;;  %v496_v59 = vpop.f32.mrb[1].mxu1 }
 0x2be   : > { %v505_v60 = vadd.f32 %v495_v58, %v908_v21 }
 0x2bf   : > { %v499_v61 = vpop.f32.mrb[2].mxu1 }
 0x2c0   : > { %507 = vst.msk [vmem:[%s217_s10] sm:$0xff] %vm247_vm2, %v505_v60  ;;  %v500_v62 = vadd.f32 %v594_v56, %v499_v61  ;;  %v501_v63 = vpop.f32.mrb[3].mxu1 }
 0x2c2   : > { %v506_v21 = vadd.f32 %v500_v62, %v915_v25 }
 0x2c4   : > { %508 = vst.msk [vmem:[%s217_s10 + $0x8] sm:$0xff] %vm247_vm2, %v506_v21 }
 0x2c5   : > { %732 = shalt.err (!%p729_p3)
}
 0x2c6   : > { %s733_s16 = scalar_lea.hbm %s1088_s11, 256  ;;  %s737_s25 = scalar_lea.hbm %s1140_s5, 512 }
 0x2c7   : > { %p734_p4 = scmp.ne.s32.totalorder %s1088_s11, %s733_s16  ;;  %p738_p9 = scmp.lt.u32.totalorder %s1088_s11, %s1140_s5 }
 0x2c8   : > { %p739_p10 = scmp.lt.u32.totalorder %s737_s25, %s733_s16  ;;  %p741_p12 = scmp.lt.u32.totalorder %s733_s16, %s1088_s11 }
 0x2c9   : > { %p735_p7 = pnand %p734_p4, %p856_p5 }
 0x2ca   : > { %p740_p11 = por %p739_p10, %p738_p9 }
 0x2cb   : > { %p736_p8 = pneg %p735_p7 }
 0x2cc   : > { %p742_p13 = por %p741_p12, %p740_p11 }
 0x2ce   : > { %p743_p0 = pnand %p742_p13, %p736_p8 }
 0x2d0   : > { %746 = shalt.err (!%p743_p0)
}
 0x2d1   : > { %s786_s10 = smov 128   ;;  %s787_s7 = smov 8  }
 0x2d2   : > { %676 = dma.vmem_to_hbm [thread:$0]  (%p856_p5), %s1090_s6, 256, %s1088_s11, %s1094_s22, %s786_s10, %s786_s10, %s787_s7  }
 0x2d3 PF: > { %p682_p1 = scmp.ge.s32.totalorder %s781_s21, 2  ;;  %s538_s8 = sand.u32 1, %s769_s18  }
 0x2d4   : > { %s539_s9 = scalar_lea.sflag [#allocation3], %s538_s8 }
 0x2d5   : > { %p679_p2 = pnand %p682_p1, %p860_p6 }
 0x2d7   : > { %764 = dma.done.wait (!%p679_p2), %s539_s9, 256  }
 0x2d8   : > { %766 = vsyncadd (!%p679_p2), %s539_s9, 4294967040  ;;  %p15_p3 = scmp.ge.s32.totalorder %s843_s24, 4   ;;  %s1143_s18 = smov %s773_s19 }
 0x2d9   : > { %s1144_s19 = smov %s777_s20  ;;  %s1145_s20 = smov %s854_s27 }
 0x2da   : > { %s1146_s21 = smov %s843_s24  ;;  %17 = sbr.rel (!%p15_p3) target bundleno = 3 (0x3), region = 75 }
 0x2e1   :  { %544 = vsyncpa [#allocation3], 1 }
 0x2e2   :  { %546 = vsyncpa [#allocation3 + $0x1], 1 }

</bundles_post_ra>
